<compile_context>
chip_gen: v7x
topology: tpu7x:2x2x1
jax: 0.10.0
libtpu: 0.0.40
codegen_flags: <defaults>
</compile_context>

<pallas_src>
import functools

import jax
import jax.numpy as jnp
from jax.experimental import pallas as pl
from jax.experimental.pallas import tpu as pltpu

BN_EPS = 1e-5


def _round_up(v, m):
    return (v + m - 1) // m * m


def residual_kernel(x_ref, w_ref, gamma_ref, beta_ref, y_ref):
    """Fused Linear + BatchNorm1d(train) + ReLU for one feature tile.

    x_ref:     (B, Ip)    full (padded) input batch
    w_ref:     (Ip, TO)   fc weight slice (in x out layout)
    gamma_ref: (1, TO)    BN weight slice
    beta_ref:  (1, TO)    BN bias slice
    y_ref:     (B, TO)    relu(bn(x @ w)) for this feature tile
    """
    x = x_ref[...]

    # Linear on the MXU. The fc bias is omitted on purpose: training-mode BN
    # subtracts the batch mean, which cancels a per-feature bias exactly.
    h = jnp.dot(x, w_ref[...], preferred_element_type=jnp.float32)

    # BatchNorm1d, training mode: biased variance over the batch dimension.
    inv_n = 1.0 / h.shape[0]
    mean = jnp.sum(h, axis=0, keepdims=True) * inv_n
    centered = h - mean
    var = jnp.sum(centered * centered, axis=0, keepdims=True) * inv_n

    # Fold gamma into the inverse std: one broadcast multiply instead of two.
    scale = jax.lax.rsqrt(var + BN_EPS) * gamma_ref[...]
    y = centered * scale + beta_ref[...]

    # ReLU, store only the y half (lane-dense tile).
    y_ref[...] = jnp.maximum(y, 0.0).astype(y_ref.dtype)


@functools.partial(jax.jit, static_argnames=("feat_tile",))
def residual_forward(x, w, b, gamma, beta, *, feat_tile=512):
    """x: (B, I) f32; w: (I, O); b, gamma, beta: (O,). Returns (B, O + I).

    `b` (the fc bias) is accepted for API parity with the PyTorch module but
    is not used: it is mathematically cancelled by the BN mean subtraction.
    """
    del b  # cancelled by training-mode BatchNorm; dead work if passed in.

    B, I = x.shape
    O = w.shape[1]

    # Lane-dense padding of the feature axes (multiples of 128).
    I_pad = _round_up(I, 128)
    O_pad = _round_up(O, 128)
    TO = _round_up(min(feat_tile, O_pad), 128)   # feature tile (lane-dense)
    O_pad = _round_up(O_pad, TO)                 # make grid extent exact

    xp = jnp.pad(x, ((0, 0), (0, I_pad - I)))
    wp = jnp.pad(w, ((0, I_pad - I), (0, O_pad - O)))
    gp = jnp.pad(gamma, (0, O_pad - O)).reshape(1, O_pad)
    bp = jnp.pad(beta, (0, O_pad - O)).reshape(1, O_pad)

    y_pad = pl.pallas_call(
        residual_kernel,
        out_shape=jax.ShapeDtypeStruct((B, O_pad), x.dtype),
        grid_spec=pltpu.PrefetchScalarGridSpec(
            num_scalar_prefetch=0,
            grid=(O_pad // TO,),
            in_specs=[
                pl.BlockSpec((B, I_pad), lambda j: (0, 0)),   # full batch
                pl.BlockSpec((I_pad, TO), lambda j: (0, j)),  # weight slice
                pl.BlockSpec((1, TO), lambda j: (0, j)),      # gamma slice
                pl.BlockSpec((1, TO), lambda j: (0, j)),      # beta slice
            ],
            out_specs=pl.BlockSpec((B, TO), lambda j: (0, j)),
        ),
        compiler_params=pltpu.CompilerParams(
            # Feature tiles are fully independent -> megacore sharding on v7x.
            dimension_semantics=("parallel",),
            # Explicit, conservative scoped-VMEM budget (fits v7x's 64 MiB).
            vmem_limit_bytes=32 * 1024 * 1024,
        ),
    )(xp, wp, gp, bp)

    # Unpad y and do the passthrough concat outside the kernel store path.
    y = y_pad[:, :O]
    return jnp.concatenate([y, x], axis=1)


def reference_forward(x, w, b, gamma, beta):
    """Pure-JAX reference mirroring the PyTorch module (training-mode BN)."""
    h = x @ w + b
    mean = h.mean(axis=0, keepdims=True)
    var = ((h - mean) ** 2).mean(axis=0, keepdims=True)  # biased
    y = (h - mean) / jnp.sqrt(var + BN_EPS) * gamma + beta
    y = jnp.maximum(y, 0.0)
    return jnp.concatenate([y, x], axis=1)


if __name__ == "__main__":
    # Small shapes consistent with Residual(i, o): batch=8, i=32, o=32.
    B, I, O = 8, 32, 32

    key = jax.random.PRNGKey(0)
    kx, kw, kb = jax.random.split(key, 3)

    x = jax.random.normal(kx, (B, I), dtype=jnp.float32)

    # Deterministic parameter init (PyTorch-style uniform bound 1/sqrt(I)).
    bound = 1.0 / (I ** 0.5)
    w = jax.random.uniform(kw, (I, O), minval=-bound, maxval=bound,
                           dtype=jnp.float32)
    b = jax.random.uniform(kb, (O,), minval=-bound, maxval=bound,
                           dtype=jnp.float32)
    gamma = jnp.ones((O,), dtype=jnp.float32)   # BatchNorm1d default weight
    beta = jnp.zeros((O,), dtype=jnp.float32)   # BatchNorm1d default bias

    out = residual_forward(x, w, b, gamma, beta)
    out = jax.block_until_ready(out)

    ref = reference_forward(x, w, b, gamma, beta)
    assert out.shape == (B, O + I), out.shape
    # (The kernel drops the fc bias, which BN cancels exactly in real
    #  arithmetic; allow tiny float rounding differences vs. the reference.)
    assert jnp.allclose(out, ref, atol=1e-4, rtol=1e-4), "mismatch vs reference"

    print("KERNEL_OK")
</pallas_src>

<mosaic_0001>
module attributes {stable_mosaic.version = 11 : i64} {
  func.func @residual_kernel(%arg0: i32, %arg1: memref<8x128xf32, #tpu.memory_space<vmem>>, %arg2: memref<128x128xf32, #tpu.memory_space<vmem>>, %arg3: memref<1x128xf32, #tpu.memory_space<vmem>>, %arg4: memref<1x128xf32, #tpu.memory_space<vmem>>, %arg5: memref<8x128xf32, #tpu.memory_space<vmem>>) attributes {dimension_semantics = [#tpu.dimension_semantics<parallel>], iteration_bounds = array<i64: 1>, scalar_prefetch = 0 : i64, scratch_operands = 0 : i64, tpu.core_type = #tpu.core_type<tc>, window_params = [{pipeline_mode = #tpu.pipeline_mode<synchronous>, transform_indices = @transform_0, window_bounds = array<i64: 8, 128>}, {transform_indices = @transform_1, window_bounds = array<i64: 128, 128>}, {transform_indices = @transform_2, window_bounds = array<i64: 1, 128>}, {transform_indices = @transform_3, window_bounds = array<i64: 1, 128>}, {transform_indices = @transform_4, window_bounds = array<i64: 8, 128>}]} {
    %c0 = arith.constant 0 : index
    %c0_0 = arith.constant 0 : index
    %0 = vector.load %arg1[%c0, %c0_0] : memref<8x128xf32, #tpu.memory_space<vmem>>, vector<8x128xf32>
    %c0_1 = arith.constant 0 : index
    %c0_2 = arith.constant 0 : index
    %1 = vector.load %arg2[%c0_1, %c0_2] : memref<128x128xf32, #tpu.memory_space<vmem>>, vector<128x128xf32>
    %cst = arith.constant dense<0.000000e+00> : vector<8x128xf32>
    %2 = tpu.matmul %0, %1, %cst {dimension_numbers = #tpu.dot_dimension_numbers<[1], [0], [0], [1], [0, 0, 1, 1], [], []>} : vector<8x128xf32>, vector<128x128xf32>, vector<8x128xf32> -> vector<8x128xf32>
    %cst_3 = arith.constant dense<0.000000e+00> : vector<128xf32>
    %3 = vector.multi_reduction <add>, %2, %cst_3 [0] : vector<8x128xf32> to vector<128xf32>
    %4 = vector.shape_cast %3 : vector<128xf32> to vector<1x128xf32>
    %cst_4 = arith.constant 1.250000e-01 : f32
    %5 = vector.broadcast %cst_4 : f32 to vector<1x128xf32>
    %6 = arith.mulf %4, %5 : vector<1x128xf32>
    %7 = vector.broadcast %6 : vector<1x128xf32> to vector<8x128xf32>
    %8 = arith.subf %2, %7 : vector<8x128xf32>
    %9 = arith.mulf %8, %8 : vector<8x128xf32>
    %cst_5 = arith.constant dense<0.000000e+00> : vector<128xf32>
    %10 = vector.multi_reduction <add>, %9, %cst_5 [0] : vector<8x128xf32> to vector<128xf32>
    %11 = vector.shape_cast %10 : vector<128xf32> to vector<1x128xf32>
    %cst_6 = arith.constant 1.250000e-01 : f32
    %12 = vector.broadcast %cst_6 : f32 to vector<1x128xf32>
    %13 = arith.mulf %11, %12 : vector<1x128xf32>
    %cst_7 = arith.constant 9.99999974E-6 : f32
    %14 = vector.broadcast %cst_7 : f32 to vector<1x128xf32>
    %15 = arith.addf %13, %14 : vector<1x128xf32>
    %16 = math.rsqrt %15 : vector<1x128xf32>
    %c0_8 = arith.constant 0 : index
    %c0_9 = arith.constant 0 : index
    %17 = vector.load %arg3[%c0_8, %c0_9] : memref<1x128xf32, #tpu.memory_space<vmem>>, vector<1x128xf32>
    %18 = arith.mulf %16, %17 : vector<1x128xf32>
    %19 = vector.broadcast %18 : vector<1x128xf32> to vector<8x128xf32>
    %20 = arith.mulf %8, %19 : vector<8x128xf32>
    %c0_10 = arith.constant 0 : index
    %c0_11 = arith.constant 0 : index
    %21 = vector.load %arg4[%c0_10, %c0_11] : memref<1x128xf32, #tpu.memory_space<vmem>>, vector<1x128xf32>
    %22 = vector.broadcast %21 : vector<1x128xf32> to vector<8x128xf32>
    %23 = arith.addf %20, %22 : vector<8x128xf32>
    %cst_12 = arith.constant 0.000000e+00 : f32
    %24 = vector.broadcast %cst_12 : f32 to vector<8x128xf32>
    %25 = arith.maximumf %23, %24 : vector<8x128xf32>
    %c0_13 = arith.constant 0 : index
    %c0_14 = arith.constant 0 : index
    %26 = vector.load %arg5[%c0_13, %c0_14] : memref<8x128xf32, #tpu.memory_space<vmem>>, vector<8x128xf32>
    tpu.vector_store %arg5[%c0_13, %c0_14], %25 {strides = array<i32>} : memref<8x128xf32, #tpu.memory_space<vmem>>, vector<8x128xf32>,
    return
  }
  func.func @transform_0(%arg0: i32) -> (i32, i32) {
    %c0_i32 = arith.constant 0 : i32
    %c0_i32_0 = arith.constant 0 : i32
    %c0_i32_1 = arith.constant 0 : i32
    return %c0_i32, %c0_i32_0 : i32, i32
  }
  func.func @transform_1(%arg0: i32) -> (i32, i32) {
    %c0_i32 = arith.constant 0 : i32
    %c0_i32_0 = arith.constant 0 : i32
    return %c0_i32, %arg0 : i32, i32
  }
  func.func @transform_2(%arg0: i32) -> (i32, i32) {
    %c0_i32 = arith.constant 0 : i32
    %c0_i32_0 = arith.constant 0 : i32
    return %c0_i32, %arg0 : i32, i32
  }
  func.func @transform_3(%arg0: i32) -> (i32, i32) {
    %c0_i32 = arith.constant 0 : i32
    %c0_i32_0 = arith.constant 0 : i32
    return %c0_i32, %arg0 : i32, i32
  }
  func.func @transform_4(%arg0: i32) -> (i32, i32) {
    %c0_i32 = arith.constant 0 : i32
    %c0_i32_0 = arith.constant 0 : i32
    return %c0_i32, %arg0 : i32, i32
  }
}

</mosaic_0001>

<bundles_post_ra>
// kernel: residual_forward.1
= control target key start
LH: loop header
LB: loop body
LE: loop exit
PB: predicated region body
PF: predicated region fallthrough
CT: control target
= control target key end

     0   :  { %v225_v0 = vmov 0.0|0.0   ;;  %vm226_vm0 = vmmov 0   ;;  %v227_v4 = vmov 0.0   ;;  %v124_v46 = vlaneseq  ;;  %s313_s1 = inlined_call_operand.vmem [shape: f32[128,128], index: 1, kind: input, shape index: {}]   ;;  %s314_s0 = inlined_call_operand.vmem [shape: f32[8,128], index: 0, kind: input, shape index: {}]   ;;  %s315_s2 = inlined_call_operand.vmem [shape: f32[1,128], index: 2, kind: input, shape index: {}]   ;;  %s316_s3 = inlined_call_operand.vmem [shape: f32[1,128], index: 3, kind: input, shape index: {}]   ;;  %s317_s4 = inlined_call_operand.vmem [shape: f32[8,128], index: 4, kind: output, shape index: {}]  }
   0x1   :  { %196 = vmatprep.subr.bf16.mxu0 %v225_v0  ;;  %v18_v1 = vld [vmem:[%s313_s1] sm:$0xff]  ;;  %v19_v2 = vld [vmem:[%s313_s1 + $0x8] sm:$0xff]  ;;  %v20_v3 = vld [vmem:[%s313_s1 + $0x10] sm:$0xff]  ;;  %193 = vmatprep.mubr.msk.f32.mxu0 %vm226_vm0, %v227_v4 }
   0x2   :  { %v197_v5 = vpack.c.bf16 %v19_v2, %v18_v1  ;;  %v21_v6 = vld [vmem:[%s313_s1 + $0x18] sm:$0xff]  ;;  %v22_v8 = vld [vmem:[%s313_s1 + $0x20] sm:$0xff]  ;;  %v23_v9 = vld [vmem:[%s313_s1 + $0x28] sm:$0xff]  ;;  %v125_v47 = vshrl.u32 %v124_v46, 7 }
   0x3   :  { %v200_v7 = vpack.c.bf16 %v21_v6, %v20_v3  ;;  %v203_v10 = vpack.c.bf16 %v23_v9, %v22_v8  ;;  %v24_v11 = vld [vmem:[%s313_s1 + $0x30] sm:$0xff]  ;;  %v25_v12 = vld [vmem:[%s313_s1 + $0x38] sm:$0xff]  ;;  %v26_v14 = vld [vmem:[%s313_s1 + $0x40] sm:$0xff] }
   0x4   :  { %198 = vmatpush3.bf16.msra.mxu0 %v197_v5  ;;  %v206_v13 = vpack.c.bf16 %v25_v12, %v24_v11  ;;  %v27_v15 = vld [vmem:[%s313_s1 + $0x48] sm:$0xff]  ;;  %v28_v17 = vld [vmem:[%s313_s1 + $0x50] sm:$0xff]  ;;  %v29_v18 = vld [vmem:[%s313_s1 + $0x58] sm:$0xff]  ;;  %v126_v49 = vsub.s32 0, %v125_v47 }
   0x5   :  { %199 = vmatprep.subr.bf16.mxu0 %v225_v0  ;;  %v209_v16 = vpack.c.bf16 %v27_v15, %v26_v14  ;;  %v212_v19 = vpack.c.bf16 %v29_v18, %v28_v17  ;;  %v30_v20 = vld [vmem:[%s313_s1 + $0x60] sm:$0xff]  ;;  %v31_v21 = vld [vmem:[%s313_s1 + $0x68] sm:$0xff]  ;;  %v32_v23 = vld [vmem:[%s313_s1 + $0x70] sm:$0xff] }
   0x6   :  { %v215_v22 = vpack.c.bf16 %v31_v21, %v30_v20  ;;  %v33_v24 = vld [vmem:[%s313_s1 + $0x78] sm:$0xff]  ;;  %v17_v26 = vld [vmem:[%s314_s0] sm:$0xff] }
   0x7   :  { %v218_v25 = vpack.c.bf16 %v33_v24, %v32_v23  ;;  %v122_v48 = vld [vmem:[%s315_s2] sm:$0x1] }
   0x8   :  { %201 = vmatpush3.bf16.msra.mxu0 %v200_v7  ;;  %v143_v53 = vld [vmem:[%s316_s3] ss:$0 sm:$0xff] }
   0x9   :  { %202 = vmatprep.subr.bf16.mxu0 %v225_v0 }
   0xc   :  { %204 = vmatpush3.bf16.msra.mxu0 %v203_v10 }
   0xd   :  { %205 = vmatprep.subr.bf16.mxu0 %v225_v0 }
  0x10   :  { %207 = vmatpush3.bf16.msra.mxu0 %v206_v13 }
  0x11   :  { %208 = vmatprep.subr.bf16.mxu0 %v225_v0 }
  0x14   :  { %210 = vmatpush3.bf16.msra.mxu0 %v209_v16 }
  0x15   :  { %211 = vmatprep.subr.bf16.mxu0 %v225_v0 }
  0x18   :  { %213 = vmatpush3.bf16.msra.mxu0 %v212_v19 }
  0x19   :  { %214 = vmatprep.subr.bf16.mxu0 %v225_v0 }
  0x1c   :  { %216 = vmatpush3.bf16.msra.mxu0 %v215_v22 }
  0x1d   :  { %217 = vmatprep.subr.bf16.mxu0 %v225_v0 }
  0x20   :  { %219 = vmatpush3.bf16.msra.mxu0 %v218_v25 }
  0x23   :  { %194 = vmatmul.mubr.f32.vlgmr.msra.gmra.mrb[0].mxu0 %v17_v26 }
  0xf6   :  { %v100_v27 = vpop.f32.mrb[0].mxu0 }
  0xf7   :  { %v104_v28 = vrot.slane %v100_v27, 4  ;;  %v195_v29 = vpop.f32.mrb[1].mxu0 }
  0xf9   :  { %v105_v30 = vadd.f32 %v104_v28, %v100_v27 }
  0xfb   :  { %v106_v31 = vrot.slane %v105_v30, 2 }
  0xfd   :  { %v107_v32 = vadd.f32 %v106_v31, %v105_v30 }
  0xff   :  { %v108_v33 = vrot.slane %v107_v32, 1 }
 0x101   :  { %v109_v34 = vadd.f32 %v108_v33, %v107_v32 }
 0x103   :  { %v110_v35 = vmul.f32 0.125, %v109_v34 }
 0x105   :  { %v111_v36 = vsub.f32 %v100_v27, %v110_v35 }
 0x107   :  { %v112_v37 = vmul.f32 %v111_v36, %v111_v36 }
 0x109   :  { %v113_v38 = vrot.slane %v112_v37, 4 }
 0x10b   :  { %v114_v39 = vadd.f32 %v113_v38, %v112_v37 }
 0x10d   :  { %v115_v40 = vrot.slane %v114_v39, 2 }
 0x10f   :  { %v116_v41 = vadd.f32 %v115_v40, %v114_v39 }
 0x111   :  { %v117_v42 = vrot.slane %v116_v41, 1 }
 0x113   :  { %v118_v43 = vadd.f32 %v117_v42, %v116_v41 }
 0x115   :  { %v119_v44 = vmul.f32 0.125, %v118_v43 }
 0x117   :  { %v120_v45 = vadd.f32 1e-05, %v119_v44 }
 0x119   :  { %223 = vrsqrt.f32 %v120_v45 }
 0x123   :  { %v224_v50 = vpop.eup %223 }
 0x124   :  { %v123_v51 = vmul.f32 %v224_v50, %v122_v48 }
 0x126   :  { %v127_v52 = vrot.slane %v123_v51, %v126_v49 }
 0x128   :  { %v128_v54 = vmul.f32 %v127_v52, %v111_v36 }
 0x12a   :  { %v136_v55 = vadd.f32 %v143_v53, %v128_v54 }
 0x12c   :  { %v137_v56 = vmax.f32 %v136_v55, 0.0 }
 0x12e   :  { %138 = vst [vmem:[%s317_s4] sm:$0xff] %v137_v56 }

</bundles_post_ra>
